<compile_context>
chip_gen: v5e
topology: v5e:2x2
jax: 0.10.0
libtpu: 0.0.40
codegen_flags: <defaults>
</compile_context>

<pallas_src>
import jax
import jax.numpy as jnp
from jax import lax
from jax.experimental import pallas as pl
from jax.experimental.pallas import tpu as pltpu

_EPS = 1e-12  # matches torch.nn.functional.normalize(eps=1e-12)


def _round_up(x, m):
    return ((x + m - 1) // m) * m


def _cos_linear_kernel(x_ref, wt_ref, invw_ref, o_ref):
    # x_ref:    (tm, K)  float32   (full feature dim resident)
    # wt_ref:   (K, tn)  compute dtype (bf16 default), pre-transposed W
    # invw_ref: (1, tn)  float32   precomputed 1 / max(||W_j||, eps)
    # o_ref:    (tm, tn) float32
    x = x_ref[...]

    # Per-row inverse norms of x.  Recomputed per class tile, but the
    # sum-of-squares is ~1/tn of the MXU work per step and rsqrt runs on the
    # EUP slot, so it stays hidden behind the matmul (and is megacore-safe,
    # unlike caching in scratch gated on program_id(1)==0).
    ss = jnp.sum(x * x, axis=-1, keepdims=True)                  # (tm, 1)
    inv_x = lax.rsqrt(jnp.maximum(ss, _EPS * _EPS))              # == 1/max(||x||, eps)

    # Unnormalized matmul on the MXU, natural (M,K)x(K,N) feed (no .T).
    cos = jnp.dot(x.astype(wt_ref.dtype), wt_ref[...],
                  preferred_element_type=jnp.float32)            # (tm, tn) f32
    cos = cos * inv_x * invw_ref[...]
    o_ref[...] = jnp.clip(cos, -1.0, 1.0).astype(o_ref.dtype)


def cos_linear(x, weight, *, tm=256, tn=256, compute_dtype=jnp.bfloat16):
    """x: (B, in_features), weight: (out_features, in_features) -> (B, out_features)."""
    B, K = x.shape
    N, Kw = weight.shape
    assert K == Kw

    x = x.astype(jnp.float32)
    w = weight.astype(jnp.float32)

    # Hoisted one-shot W inverse row norms (exactly torch's 1/max(||w||, eps)).
    inv_w = lax.rsqrt(jnp.maximum(jnp.sum(w * w, axis=1), _EPS * _EPS))
    inv_w = inv_w.reshape(1, N)

    # Pre-transpose + cast W once in the wrapper (one-time O(N*K)).
    w_t = w.T.astype(compute_dtype)                              # (K, N)

    # Clamp tiles to the (padded) problem size, then pad to tile multiples so
    # output stores are lane-dense and blocks satisfy the (8,128) constraint.
    tm = max(8, min(tm, _round_up(B, 8)))
    tn = max(128, min(tn, _round_up(N, 128)))
    B_pad = _round_up(B, tm)
    N_pad = _round_up(N, tn)
    if B_pad != B:
        x = jnp.pad(x, ((0, B_pad - B), (0, 0)))
    if N_pad != N:
        w_t = jnp.pad(w_t, ((0, 0), (0, N_pad - N)))
        inv_w = jnp.pad(inv_w, ((0, 0), (0, N_pad - N)))

    grid = (B_pad // tm, N_pad // tn)

    out = pl.pallas_call(
        _cos_linear_kernel,
        out_shape=jax.ShapeDtypeStruct((B_pad, N_pad), jnp.float32),
        grid_spec=pltpu.PrefetchScalarGridSpec(
            num_scalar_prefetch=0,
            grid=grid,
            in_specs=[
                pl.BlockSpec((tm, K), lambda i, j: (i, 0)),   # x tile (kept across j)
                pl.BlockSpec((K, tn), lambda i, j: (0, j)),   # W^T tile
                pl.BlockSpec((1, tn), lambda i, j: (0, j)),   # hoisted 1/||W|| tile
            ],
            out_specs=pl.BlockSpec((tm, tn), lambda i, j: (i, j)),
        ),
        compiler_params=pltpu.CompilerParams(
            dimension_semantics=("parallel", "parallel"),
        ),
    )(x, w_t, inv_w)

    if B_pad != B or N_pad != N:
        out = out[:B, :N]
    return out


def init_weight(key, out_features, in_features):
    """Deterministic re-implementation of:
       weight.data.uniform_(-1, 1).renorm_(2, 1, 1e-05).mul_(100000.0)
    renorm_ with dim=1 rescales each *column* to L2 norm <= 1e-5,
    then the whole tensor is scaled by 1e5.
    """
    w = jax.random.uniform(key, (out_features, in_features),
                           dtype=jnp.float32, minval=-1.0, maxval=1.0)
    maxnorm = 1e-5
    col_norm = jnp.sqrt(jnp.sum(w * w, axis=0, keepdims=True))
    scale = jnp.where(col_norm > maxnorm, maxnorm / (col_norm + 1e-7), 1.0)
    return w * scale * 100000.0


def cos_linear_ref(x, weight):
    def _norm(v):
        n = jnp.sqrt(jnp.sum(v * v, axis=-1, keepdims=True))
        return v / jnp.maximum(n, _EPS)
    xn = _norm(x.astype(jnp.float32))
    wn = _norm(weight.astype(jnp.float32))
    return jnp.clip(xn @ wn.T, -1.0, 1.0)


if __name__ == "__main__":
    # Small shapes consistent with the module (real model: in=512, out=8631).
    # B=6 / OUT=200 deliberately exercise both padding paths.
    B, IN_FEATURES, OUT_FEATURES = 6, 32, 200

    key = jax.random.PRNGKey(0)
    kx, kw = jax.random.split(key)
    x = jax.random.normal(kx, (B, IN_FEATURES), dtype=jnp.float32)
    weight = init_weight(kw, OUT_FEATURES, IN_FEATURES)

    ref = cos_linear_ref(x, weight)

    # Default fast path: bf16 MXU operands, f32 accumulation.
    out = jax.block_until_ready(cos_linear(x, weight))
    assert out.shape == (B, OUT_FEATURES)
    assert jnp.all(out <= 1.0) and jnp.all(out >= -1.0)
    assert jnp.allclose(out, ref, atol=2e-2, rtol=0), float(jnp.max(jnp.abs(out - ref)))

    # Full-f32 matmul path for a tight numeric check against the reference.
    out_f32 = jax.block_until_ready(cos_linear(x, weight, compute_dtype=jnp.float32))
    assert jnp.allclose(out_f32, ref, atol=1e-4, rtol=1e-4), \
        float(jnp.max(jnp.abs(out_f32 - ref)))

    print("KERNEL_OK")
</pallas_src>

<mosaic_0001>
module attributes {stable_mosaic.version = 11 : i64} {
  func.func @_cos_linear_kernel(%arg0: i32, %arg1: i32, %arg2: memref<8x32xf32, #tpu.memory_space<vmem>>, %arg3: memref<32x256xbf16, #tpu.memory_space<vmem>>, %arg4: memref<1x256xf32, #tpu.memory_space<vmem>>, %arg5: memref<8x256xf32, #tpu.memory_space<vmem>>) attributes {dimension_semantics = [#tpu.dimension_semantics<parallel>, #tpu.dimension_semantics<parallel>], iteration_bounds = array<i64: 1, 1>, scalar_prefetch = 0 : i64, scratch_operands = 0 : i64, tpu.core_type = #tpu.core_type<tc>, window_params = [{transform_indices = @transform_0, window_bounds = array<i64: 8, 32>}, {transform_indices = @transform_1, window_bounds = array<i64: 32, 256>}, {transform_indices = @transform_2, window_bounds = array<i64: 1, 256>}, {transform_indices = @transform_3, window_bounds = array<i64: 8, 256>}]} {
    %c0 = arith.constant 0 : index
    %c0_0 = arith.constant 0 : index
    %0 = vector.load %arg2[%c0, %c0_0] : memref<8x32xf32, #tpu.memory_space<vmem>>, vector<8x32xf32>
    %1 = arith.mulf %0, %0 : vector<8x32xf32>
    %cst = arith.constant dense<0.000000e+00> : vector<8xf32>
    %2 = vector.multi_reduction <add>, %1, %cst [1] : vector<8x32xf32> to vector<8xf32>
    %3 = vector.shape_cast %2 : vector<8xf32> to vector<8x1xf32>
    %cst_1 = arith.constant 1.000000e-24 : f32
    %4 = vector.broadcast %cst_1 : f32 to vector<8x1xf32>
    %5 = arith.maximumf %3, %4 : vector<8x1xf32>
    %6 = math.rsqrt %5 : vector<8x1xf32>
    %7 = arith.truncf %0 : vector<8x32xf32> to vector<8x32xbf16>
    %c0_2 = arith.constant 0 : index
    %c0_3 = arith.constant 0 : index
    %8 = vector.load %arg3[%c0_2, %c0_3] : memref<32x256xbf16, #tpu.memory_space<vmem>>, vector<32x256xbf16>
    %cst_4 = arith.constant dense<0.000000e+00> : vector<8x256xf32>
    %9 = tpu.matmul %7, %8, %cst_4 {dimension_numbers = #tpu.dot_dimension_numbers<[1], [0], [0], [1], [0, 0, 1, 1], [], []>} : vector<8x32xbf16>, vector<32x256xbf16>, vector<8x256xf32> -> vector<8x256xf32>
    %10 = vector.broadcast %6 : vector<8x1xf32> to vector<8x256xf32>
    %11 = arith.mulf %9, %10 : vector<8x256xf32>
    %c0_5 = arith.constant 0 : index
    %c0_6 = arith.constant 0 : index
    %12 = vector.load %arg4[%c0_5, %c0_6] : memref<1x256xf32, #tpu.memory_space<vmem>>, vector<1x256xf32>
    %13 = vector.broadcast %12 : vector<1x256xf32> to vector<8x256xf32>
    %14 = arith.mulf %11, %13 : vector<8x256xf32>
    %cst_7 = arith.constant -1.000000e+00 : f32
    %cst_8 = arith.constant 1.000000e+00 : f32
    %15 = vector.broadcast %cst_7 : f32 to vector<8x256xf32>
    %16 = arith.maximumf %15, %14 : vector<8x256xf32>
    %17 = vector.broadcast %cst_8 : f32 to vector<8x256xf32>
    %18 = arith.minimumf %17, %16 : vector<8x256xf32>
    %c0_9 = arith.constant 0 : index
    %c0_10 = arith.constant 0 : index
    %19 = vector.load %arg5[%c0_9, %c0_10] : memref<8x256xf32, #tpu.memory_space<vmem>>, vector<8x256xf32>
    tpu.vector_store %arg5[%c0_9, %c0_10], %18 {strides = array<i32>} : memref<8x256xf32, #tpu.memory_space<vmem>>, vector<8x256xf32>,
    return
  }
  func.func @transform_0(%arg0: i32, %arg1: i32) -> (i32, i32) {
    %c0_i32 = arith.constant 0 : i32
    %c0_i32_0 = arith.constant 0 : i32
    return %arg0, %c0_i32 : i32, i32
  }
  func.func @transform_1(%arg0: i32, %arg1: i32) -> (i32, i32) {
    %c0_i32 = arith.constant 0 : i32
    %c0_i32_0 = arith.constant 0 : i32
    return %c0_i32, %arg1 : i32, i32
  }
  func.func @transform_2(%arg0: i32, %arg1: i32) -> (i32, i32) {
    %c0_i32 = arith.constant 0 : i32
    %c0_i32_0 = arith.constant 0 : i32
    return %c0_i32, %arg1 : i32, i32
  }
  func.func @transform_3(%arg0: i32, %arg1: i32) -> (i32, i32) {
    %c0_i32 = arith.constant 0 : i32
    return %arg0, %arg1 : i32, i32
  }
}

</mosaic_0001>

<bundles_post_ra>
// kernel: tpu_custom_call.1
= control target key start
LH: loop header
LB: loop body
LE: loop exit
PB: predicated region body
PF: predicated region fallthrough
CT: control target
= control target key end

     0   :  { %8 = vsyncpa [#allocation3], 0  ;;  %s339_s0 = inlined_call_operand.hbm [shape: f32[8,32], index: 0, kind: input, shape index: {}]   ;;  %s340_s1 = inlined_call_operand.hbm [shape: bf16[32,256], index: 1, kind: input, shape index: {}]   ;;  %s341_s2 = inlined_call_operand.hbm [shape: f32[1,256], index: 2, kind: input, shape index: {}]   ;;  %s342_s3 = inlined_call_operand.hbm [shape: f32[8,256], index: 3, kind: output, shape index: {}]  }
   0x1   :  { %9 = vsyncpa [#allocation6], 0  ;;  %s26_s14 = sshll.u32 %s340_s1, 4  ;;  %s27_s14 = int_to_ptr.hbm [resolvable:$true] %s26_s14 }
   0x2   :  { %10 = vsyncpa [#allocation4], 0  ;;  %s298_s15 = smov [#allocation5]   ;;  %s16_s19 = sshll.u32 %s339_s0, 4  ;;  %s17_s19 = int_to_ptr.hbm [resolvable:$true] %s16_s19 }
   0x3   :  { %s28_s16 = sshll.u32 %s298_s15, 4  ;;  %s299_s20 = smov 128   ;;  %s29_s16 = int_to_ptr.vmem [resolvable:$true] %s28_s16 }
   0x4   :  { %s300_s21 = smov 8   ;;  %s301_s22 = smov [#allocation2]  }
   0x5   :  { %34 = dma.hbm_to_vmem [thread:$0]  %s27_s14, 512, %s29_s16, [#allocation6], %s299_s20, %s299_s20, %s300_s21  }
   0x6   :  { %s18_s23 = sshll.u32 %s301_s22, 4  ;;  %s40_s26 = sshll.u32 %s341_s2, 4  ;;  %s19_s23 = int_to_ptr.vmem [resolvable:$true] %s18_s23  ;;  %s41_s26 = int_to_ptr.hbm [resolvable:$true] %s40_s26 }
   0x7   :  { %21 = dma.hbm_to_vmem [thread:$0]  %s17_s19, 128, %s19_s23, [#allocation3]  }
   0x8   :  { %s302_s1 = smov [#allocation7]  }
   0x9   :  { %s42_s27 = sshll.u32 %s302_s1, 4  ;;  %s43_s27 = int_to_ptr.vmem [resolvable:$true] %s42_s27 }
   0xa   :  { %45 = dma.hbm_to_vmem [thread:$0]  %s41_s26, 32, %s43_s27, [#allocation6]  }
   0xb   :  { %292 = dma.done.wait [#allocation3], 128  }
   0xc   :  { %293 = vsyncadd [#allocation3], 4294967168 }
   0xd   :  { %294 = dma.done.wait [#allocation6], 544  }
   0xe   :  { %295 = vsyncadd [#allocation6], 4294966752  ;;  %v174_v0 = vld [vmem:[#allocation5 + $0x10] sm:$0xf]  ;;  %v187_v1 = vld [vmem:[#allocation5 + $0x14] sm:$0xf0] }
   0xf   :  { %v186_v2 = vld [vmem:[#allocation5 + $0x14] sm:$0xf]  ;;  %v175_v3 = vor.u32 %v187_v1, %v174_v0  ;;  %v176_v4 = vld [vmem:[#allocation5 + $0x18] sm:$0xf0]  ;;  %vm61_vm0 = vcmask 261120   ;;  %s303_s0 = smov [#allocation8]  }
  0x10   :  { %v59_v5 = vld [vmem:[#allocation2] sm:$0xff]  ;;  %v166_v6 = vld [vmem:[#allocation5] sm:$0xf]  ;;  %v179_v7 = vor.u32 %v186_v2, %v176_v4  ;;  %v185_v9 = vld [vmem:[#allocation5 + $0x4] sm:$0xf0]  ;;  %s151_s2 = sshll.u32 %s303_s0, 4  ;;  %s152_s2 = int_to_ptr.vmem [resolvable:$true] %s151_s2 }
  0x11   :  { %v60_v8 = vmul.f32 %v59_v5, %v59_v5  ;;  %v184_v10 = vld [vmem:[#allocation5 + $0x4] sm:$0xf]  ;;  %v168_v11 = vld [vmem:[#allocation5 + $0x8] sm:$0xf0]  ;;  %110 = vmatpush.bf16.msra.mxu0 %v175_v3  ;;  %v167_v12 = vor.u32 %v185_v9, %v166_v6  ;;  %v76_v15 = vpack.c.bf16 %v59_v5, %v59_v5  ;;  %v132_v24 = vld [vmem:[#allocation7] sm:$0x3] }
  0x12   :  { %123 = vmatpush.bf16.msra.mxu1 %v179_v7  ;;  %v171_v14 = vor.u32 %v184_v10, %v168_v11  ;;  %v134_v27 = vperm.slane %v132_v24, 0  ;;  %v135_v28 = vperm.slane %v132_v24, 1  ;;  %s153_s30 = sshll.u32 %s342_s3, 4  ;;  %s154_s30 = int_to_ptr.hbm [resolvable:$true] %s153_s30 }
  0x13   :  { %v62_v13 = vsel %vm61_vm0, %v60_v8, 0.0 }
  0x14   :  { %63 = vadd.xlane.f32.xlu0 %v62_v13 }
  0x15   :  { %111 = vmatpush.bf16.msra.mxu0 %v167_v12 }
  0x16   :  { %124 = vmatpush.bf16.msra.mxu1 %v171_v14 }
  0x18   :  { %180 = vmatmul.msk.bf16.vlgmr.msra.gmra.mxu0 %vm61_vm0, %v76_v15 }
  0x19   :  { %181 = vmatmul.msk.bf16.vlgmr.msra.gmra.mxu1 %vm61_vm0, %v76_v15 }
  0x87   :  { %v64_v16 = vpop.xlane.xlu0 %63 }
  0x88   :  { %v65_v17 = vmax.f32 %v64_v16, 1e-24 }
  0x8a   :  { %194 = vrsqrt.f32 %v65_v17  ;;  %vm72_vm2 = vweird.f32 %v65_v17 }
  0x90   :  { %v195_v18 = vpop.eup %194 }
  0x91   :  { %v67_v19 = vmul.f32 %v195_v18, %v65_v17  ;;  %vm73_vm1 = vweird.f32 %v195_v18 }
  0x92   :  { %vm74_vm3 = vmor %vm72_vm2, %vm73_vm1 }
  0x93   :  { %v68_v20 = vmul.f32 %v195_v18, %v67_v19 }
  0x95   :  { %v69_v21 = vmul.f32 0.5, %v68_v20  ;;  %v113_v22 = vpop.f32.mrf.mxu0 }
  0x96   :  { %v126_v25 = vpop.f32.mrf.mxu1 }
  0x97   :  { %v70_v23 = vsub.f32 1.5, %v69_v21 }
  0x99   :  { %v71_v26 = vmul.f32 %v195_v18, %v70_v23 }
  0x9b   :  { %v75_v29 = vsel %vm74_vm3, %v195_v18, %v71_v26 }
  0x9c   :  { %v130_v30 = vmul.f32 %v113_v22, %v75_v29  ;;  %v131_v31 = vmul.f32 %v126_v25, %v75_v29 }
  0x9d   :  { %v115_v34 = vpop.f32.mrf.mxu0 }
  0x9e   :  { %v138_v32 = vmul.f32 %v134_v27, %v130_v30  ;;  %v139_v33 = vmul.f32 %v135_v28, %v131_v31  ;;  %v128_v35 = vpop.f32.mrf.mxu1 }
  0xa0   :  { %v182_v36 = vclamps-f32 %v138_v32, 1.0  ;;  %v183_v37 = vclamps-f32 %v139_v33, 1.0 }
  0xa2   :  { %144 = vst [vmem:[#allocation8] sm:$0xff] %v182_v36 }
  0xa3   :  { %145 = vst [vmem:[#allocation8 + $0x8] sm:$0xff] %v183_v37 }
  0xa4   :  { %156 = dma.vmem_to_hbm [thread:$0]  %s152_s2, 256, %s154_s30, [#allocation4]  }
  0xa5   :  { %296 = dma.done.wait [#allocation4], 256  }
  0xa6   :  { %297 = vsyncadd [#allocation4], 4294967040 }
  0xa7   :  { %161 = vsyncpa [#allocation3], 1 }
  0xa8   :  { %162 = vsyncpa [#allocation6], 1 }
  0xa9   :  { %163 = vsyncpa [#allocation4], 1 }

</bundles_post_ra>
